<compile_context>
chip_gen: v7x
topology: tpu7x:2x2x1
jax: 0.10.0
libtpu: 0.0.40
codegen_flags: <defaults>
</compile_context>

<pallas_src>
import functools

import jax
import jax.numpy as jnp
from jax.experimental import pallas as pl
from jax.experimental.pallas import tpu as pltpu


def fused_mha_kernel(x_ref, wqkv_ref, wproj_ref, bproj_ref, out_ref, concat_ref,
                     *, n_head, n_batch, seq_len):
    """Single-program fused MHA forward.

    x_ref:      (B*T, C)  f32   input rows (all batch elements)
    wqkv_ref:   (C, 3C)   bf16  stacked [Wq*scale | Wk | Wv], heads along lanes
    wproj_ref:  (C, C)    bf16  output projection weight (x @ W layout)
    bproj_ref:  (1, C)    f32   output projection bias
    out_ref:    (B*T, C)  f32   output rows
    concat_ref: (B*T, C)  f32   VMEM scratch holding concatenated head outputs
    """
    C = x_ref.shape[-1]
    hd = C // n_head

    # QKV projection for all rows / heads at once: bf16 MXU operands, f32 accum.
    xb = x_ref[...].astype(jnp.bfloat16)
    qkv = jnp.dot(xb, wqkv_ref[...], preferred_element_type=jnp.float32)  # (B*T, 3C)

    # Causal mask, built once and reused by every (batch, head) pair.
    row = jax.lax.broadcasted_iota(jnp.int32, (seq_len, seq_len), 0)
    col = jax.lax.broadcasted_iota(jnp.int32, (seq_len, seq_len), 1)
    causal = row >= col
    neg_big = jnp.float32(-1e30)      # finite: no NaN on fully-masked rows

    for b in range(n_batch):          # static loops, traced once
        r0 = b * seq_len
        for h in range(n_head):
            c0 = h * hd
            # 1/sqrt(hd) is already folded into the Wq columns of w_qkv.
            qh = qkv[r0:r0 + seq_len, c0:c0 + hd].astype(jnp.bfloat16)
            kh = qkv[r0:r0 + seq_len, C + c0:C + c0 + hd].astype(jnp.bfloat16)
            vh = qkv[r0:r0 + seq_len, 2 * C + c0:2 * C + c0 + hd].astype(jnp.bfloat16)

            s = jnp.dot(qh, kh.T, preferred_element_type=jnp.float32)  # (T, T) f32
            s = jnp.where(causal, s, neg_big)

            # Numerically stable softmax; statistics in f32, EUP reciprocal.
            s = s - jnp.max(s, axis=-1, keepdims=True)
            p = jnp.exp(s)
            p = p * pl.reciprocal(jnp.sum(p, axis=-1, keepdims=True), approx=True)

            # Write this head's (T, hd) output straight into the concat slab.
            concat_ref[r0:r0 + seq_len, c0:c0 + hd] = jnp.dot(
                p.astype(jnp.bfloat16), vh, preferred_element_type=jnp.float32)

    # Fused output projection over all rows: (B*T, C) @ (C, C) + bias.
    out = jnp.dot(concat_ref[...].astype(jnp.bfloat16), wproj_ref[...],
                  preferred_element_type=jnp.float32)
    out_ref[...] = (out + bproj_ref[...]).astype(out_ref.dtype)


def prepare_mha_params(wq, wk, wv, w_proj, b_proj):
    """One-time parameter transform (do this at init, not per forward call).

    wq/wk/wv: (n_head, C, hd) per-head projection weights (x @ W layout).
    Returns (w_qkv bf16 (C, 3C) with 1/sqrt(hd) folded into the Q columns,
             w_proj bf16 (C, C), b_proj f32 (1, C)).
    """
    n_head, C, hd = wq.shape
    scale = jnp.float32(hd) ** jnp.float32(-0.5)
    # (n_head, C, hd) -> (C, n_head*hd): heads concatenated along lanes,
    # matching the per-head column slicing inside the kernel.
    wq_all = jnp.transpose(wq, (1, 0, 2)).reshape(C, C) * scale
    wk_all = jnp.transpose(wk, (1, 0, 2)).reshape(C, C)
    wv_all = jnp.transpose(wv, (1, 0, 2)).reshape(C, C)
    w_qkv = jnp.concatenate([wq_all, wk_all, wv_all], axis=-1).astype(jnp.bfloat16)
    return w_qkv, w_proj.astype(jnp.bfloat16), b_proj.reshape(1, C).astype(jnp.float32)


def multi_head_attention(x, w_qkv, w_proj, b_proj, *, n_head):
    """x: (B, T, C). Weights as produced by prepare_mha_params. Returns (B, T, C)."""
    B, T, C = x.shape
    rows = B * T
    x2d = x.reshape(rows, C)   # lane-dense rows for the projection matmuls

    kernel = functools.partial(fused_mha_kernel, n_head=n_head, n_batch=B, seq_len=T)

    out2d = pl.pallas_call(
        kernel,
        out_shape=jax.ShapeDtypeStruct((rows, C), x.dtype),
        grid=(1,),   # toy workload: one fat program (see notes at top)
        in_specs=[
            pl.BlockSpec((rows, C), lambda i: (0, 0)),
            # Constant-index weights: single-buffered.
            pl.BlockSpec((C, 3 * C), lambda i: (0, 0), pipeline_mode=pl.Buffered(1)),
            pl.BlockSpec((C, C), lambda i: (0, 0), pipeline_mode=pl.Buffered(1)),
            pl.BlockSpec((1, C), lambda i: (0, 0), pipeline_mode=pl.Buffered(1)),
        ],
        out_specs=pl.BlockSpec((rows, C), lambda i: (0, 0)),
        scratch_shapes=[pltpu.VMEM((rows, C), jnp.float32)],
        compiler_params=pltpu.CompilerParams(
            dimension_semantics=("arbitrary",),
        ),
    )(x2d, w_qkv, w_proj, b_proj)

    return out2d.reshape(B, T, C)


def reference_mha(x, wq, wk, wv, w_proj, b_proj):
    """Plain-JAX f32 reference mirroring the PyTorch forward (eval mode)."""
    B, T, C = x.shape
    n_head, _, hd = wq.shape
    outs = []
    for h in range(n_head):
        q = x @ wq[h]
        k = x @ wk[h]
        v = x @ wv[h]
        wei = (q @ jnp.swapaxes(k, -2, -1)) * (hd ** -0.5)
        mask = jnp.tril(jnp.ones((T, T)))
        wei = jnp.where(mask == 0, -jnp.inf, wei)
        wei = jax.nn.softmax(wei, axis=-1)
        outs.append(wei @ v)
    cat = jnp.concatenate(outs, axis=-1)
    return cat @ w_proj + b_proj


if __name__ == "__main__":
    # Config implied by the module: n_embd, n_head, block_size.
    B, T = 2, 8          # batch, sequence (block_size)
    n_embd, n_head = 32, 4
    hd = n_embd // n_head

    key = jax.random.PRNGKey(0)
    kx, kq, kk, kv, kp, kb = jax.random.split(key, 6)

    x = jax.random.normal(kx, (B, T, n_embd), dtype=jnp.float32)
    wq = jax.random.normal(kq, (n_head, n_embd, hd), dtype=jnp.float32) * 0.1
    wk = jax.random.normal(kk, (n_head, n_embd, hd), dtype=jnp.float32) * 0.1
    wv = jax.random.normal(kv, (n_head, n_embd, hd), dtype=jnp.float32) * 0.1
    w_proj = jax.random.normal(kp, (n_embd, n_embd), dtype=jnp.float32) * 0.1
    b_proj = jax.random.normal(kb, (n_embd,), dtype=jnp.float32) * 0.1

    # One-time parameter preparation (init-time weight transform, not per call).
    w_qkv, w_proj_b, b_proj2d = prepare_mha_params(wq, wk, wv, w_proj, b_proj)

    out = multi_head_attention(x, w_qkv, w_proj_b, b_proj2d, n_head=n_head)
    out = jax.block_until_ready(out)

    ref = reference_mha(x, wq, wk, wv, w_proj, b_proj)
    assert out.shape == (B, T, n_embd)
    # Tolerance is sized to the intentional numerics deltas vs. the f32
    # reference: bf16 MXU operands (~2^-8 relative per matmul, chained over 4
    # matmuls) plus the approximate EUP reciprocal in the softmax denominator
    # (~1e-3). Expected max-abs error ~1e-2; real bugs (head misorder, missing
    # scale, wrong mask) produce O(1e-1)+ errors and still fail this check.
    assert jnp.allclose(out, ref, atol=3e-2, rtol=3e-2), (
        float(jnp.max(jnp.abs(out - ref)))
    )

    print("KERNEL_OK")
</pallas_src>

<mosaic_0001>
module attributes {stable_mosaic.version = 11 : i64} {
  func.func @fused_mha_kernel(%arg0: i32, %arg1: memref<16x32xf32, #tpu.memory_space<vmem>>, %arg2: memref<32x96xbf16, #tpu.memory_space<vmem>>, %arg3: memref<32x32xbf16, #tpu.memory_space<vmem>>, %arg4: memref<1x32xf32, #tpu.memory_space<vmem>>, %arg5: memref<16x32xf32, #tpu.memory_space<vmem>>, %arg6: memref<16x32xf32, #tpu.memory_space<vmem>>) attributes {dimension_semantics = [#tpu.dimension_semantics<arbitrary>], iteration_bounds = array<i64: 1>, scalar_prefetch = 0 : i64, scratch_operands = 1 : i64, tpu.core_type = #tpu.core_type<tc>, window_params = [{pipeline_mode = #tpu.pipeline_mode<synchronous>, transform_indices = @transform_0, window_bounds = array<i64: 16, 32>}, {pipeline_mode = #tpu.pipeline_mode<synchronous>, transform_indices = @transform_1, window_bounds = array<i64: 32, 96>}, {pipeline_mode = #tpu.pipeline_mode<synchronous>, transform_indices = @transform_2, window_bounds = array<i64: 32, 32>}, {pipeline_mode = #tpu.pipeline_mode<synchronous>, transform_indices = @transform_3, window_bounds = array<i64: 1, 32>}, {pipeline_mode = #tpu.pipeline_mode<synchronous>, transform_indices = @transform_4, window_bounds = array<i64: 16, 32>}]} {
    %c0 = arith.constant 0 : index
    %c0_0 = arith.constant 0 : index
    %0 = vector.load %arg1[%c0, %c0_0] : memref<16x32xf32, #tpu.memory_space<vmem>>, vector<16x32xf32>
    %1 = arith.truncf %0 : vector<16x32xf32> to vector<16x32xbf16>
    %c0_1 = arith.constant 0 : index
    %c0_2 = arith.constant 0 : index
    %2 = vector.load %arg2[%c0_1, %c0_2] : memref<32x96xbf16, #tpu.memory_space<vmem>>, vector<32x96xbf16>
    %cst = arith.constant dense<0.000000e+00> : vector<16x96xf32>
    %3 = tpu.matmul %1, %2, %cst {dimension_numbers = #tpu.dot_dimension_numbers<[1], [0], [0], [1], [0, 0, 1, 1], [], []>} : vector<16x32xbf16>, vector<32x96xbf16>, vector<16x96xf32> -> vector<16x96xf32>
    %4 = tpu.iota {dimensions = array<i32: 0>} : vector<8x8xi32>
    %5 = tpu.iota {dimensions = array<i32: 1>} : vector<8x8xi32>
    %6 = arith.cmpi sge, %4, %5 : vector<8x8xi32>
    %7 = vector.extract_strided_slice %3 {offsets = [0, 0], sizes = [8, 8], strides = [1, 1]} : vector<16x96xf32> to vector<8x8xf32>
    %8 = arith.truncf %7 : vector<8x8xf32> to vector<8x8xbf16>
    %9 = vector.extract_strided_slice %3 {offsets = [0, 32], sizes = [8, 8], strides = [1, 1]} : vector<16x96xf32> to vector<8x8xf32>
    %10 = arith.truncf %9 : vector<8x8xf32> to vector<8x8xbf16>
    %11 = vector.extract_strided_slice %3 {offsets = [0, 64], sizes = [8, 8], strides = [1, 1]} : vector<16x96xf32> to vector<8x8xf32>
    %12 = arith.truncf %11 : vector<8x8xf32> to vector<8x8xbf16>
    %13 = tpu.transpose %10, [1, 0] : vector<8x8xbf16> -> vector<8x8xbf16>
    %cst_3 = arith.constant dense<0.000000e+00> : vector<8x8xf32>
    %14 = tpu.matmul %8, %13, %cst_3 {dimension_numbers = #tpu.dot_dimension_numbers<[1], [0], [0], [1], [0, 0, 1, 1], [], []>} : vector<8x8xbf16>, vector<8x8xbf16>, vector<8x8xf32> -> vector<8x8xf32>
    %cst_4 = arith.constant -1.000000e+30 : f32
    %15 = vector.broadcast %cst_4 : f32 to vector<8x8xf32>
    %16 = arith.select %6, %14, %15 : vector<8x8xi1>, vector<8x8xf32>
    %cst_5 = arith.constant dense<0xFF800000> : vector<8xf32>
    %17 = vector.multi_reduction <maximumf>, %16, %cst_5 [1] : vector<8x8xf32> to vector<8xf32>
    %18 = vector.shape_cast %17 : vector<8xf32> to vector<8x1xf32>
    %19 = vector.broadcast %18 : vector<8x1xf32> to vector<8x8xf32>
    %20 = arith.subf %16, %19 : vector<8x8xf32>
    %21 = math.exp %20 : vector<8x8xf32>
    %cst_6 = arith.constant dense<0.000000e+00> : vector<8xf32>
    %22 = vector.multi_reduction <add>, %21, %cst_6 [1] : vector<8x8xf32> to vector<8xf32>
    %23 = vector.shape_cast %22 : vector<8xf32> to vector<8x1xf32>
    %24 = tpu.reciprocal %23 {approx = true} : vector<8x1xf32> -> vector<8x1xf32>
    %25 = vector.broadcast %24 : vector<8x1xf32> to vector<8x8xf32>
    %26 = arith.mulf %21, %25 : vector<8x8xf32>
    %27 = arith.truncf %26 : vector<8x8xf32> to vector<8x8xbf16>
    %cst_7 = arith.constant dense<0.000000e+00> : vector<8x8xf32>
    %28 = tpu.matmul %27, %12, %cst_7 {dimension_numbers = #tpu.dot_dimension_numbers<[1], [0], [0], [1], [0, 0, 1, 1], [], []>} : vector<8x8xbf16>, vector<8x8xbf16>, vector<8x8xf32> -> vector<8x8xf32>
    %c0_8 = arith.constant 0 : index
    %c0_9 = arith.constant 0 : index
    %29 = vector.load %arg6[%c0_8, %c0_9] : memref<16x32xf32, #tpu.memory_space<vmem>>, vector<8x8xf32>
    tpu.vector_store %arg6[%c0_8, %c0_9], %28 {strides = array<i32>} : memref<16x32xf32, #tpu.memory_space<vmem>>, vector<8x8xf32>,
    %30 = vector.extract_strided_slice %3 {offsets = [0, 8], sizes = [8, 8], strides = [1, 1]} : vector<16x96xf32> to vector<8x8xf32>
    %31 = arith.truncf %30 : vector<8x8xf32> to vector<8x8xbf16>
    %32 = vector.extract_strided_slice %3 {offsets = [0, 40], sizes = [8, 8], strides = [1, 1]} : vector<16x96xf32> to vector<8x8xf32>
    %33 = arith.truncf %32 : vector<8x8xf32> to vector<8x8xbf16>
    %34 = vector.extract_strided_slice %3 {offsets = [0, 72], sizes = [8, 8], strides = [1, 1]} : vector<16x96xf32> to vector<8x8xf32>
    %35 = arith.truncf %34 : vector<8x8xf32> to vector<8x8xbf16>
    %36 = tpu.transpose %33, [1, 0] : vector<8x8xbf16> -> vector<8x8xbf16>
    %cst_10 = arith.constant dense<0.000000e+00> : vector<8x8xf32>
    %37 = tpu.matmul %31, %36, %cst_10 {dimension_numbers = #tpu.dot_dimension_numbers<[1], [0], [0], [1], [0, 0, 1, 1], [], []>} : vector<8x8xbf16>, vector<8x8xbf16>, vector<8x8xf32> -> vector<8x8xf32>
    %cst_11 = arith.constant -1.000000e+30 : f32
    %38 = vector.broadcast %cst_11 : f32 to vector<8x8xf32>
    %39 = arith.select %6, %37, %38 : vector<8x8xi1>, vector<8x8xf32>
    %cst_12 = arith.constant dense<0xFF800000> : vector<8xf32>
    %40 = vector.multi_reduction <maximumf>, %39, %cst_12 [1] : vector<8x8xf32> to vector<8xf32>
    %41 = vector.shape_cast %40 : vector<8xf32> to vector<8x1xf32>
    %42 = vector.broadcast %41 : vector<8x1xf32> to vector<8x8xf32>
    %43 = arith.subf %39, %42 : vector<8x8xf32>
    %44 = math.exp %43 : vector<8x8xf32>
    %cst_13 = arith.constant dense<0.000000e+00> : vector<8xf32>
    %45 = vector.multi_reduction <add>, %44, %cst_13 [1] : vector<8x8xf32> to vector<8xf32>
    %46 = vector.shape_cast %45 : vector<8xf32> to vector<8x1xf32>
    %47 = tpu.reciprocal %46 {approx = true} : vector<8x1xf32> -> vector<8x1xf32>
    %48 = vector.broadcast %47 : vector<8x1xf32> to vector<8x8xf32>
    %49 = arith.mulf %44, %48 : vector<8x8xf32>
    %50 = arith.truncf %49 : vector<8x8xf32> to vector<8x8xbf16>
    %cst_14 = arith.constant dense<0.000000e+00> : vector<8x8xf32>
    %51 = tpu.matmul %50, %35, %cst_14 {dimension_numbers = #tpu.dot_dimension_numbers<[1], [0], [0], [1], [0, 0, 1, 1], [], []>} : vector<8x8xbf16>, vector<8x8xbf16>, vector<8x8xf32> -> vector<8x8xf32>
    %c0_15 = arith.constant 0 : index
    %c8 = arith.constant 8 : index
    %52 = vector.load %arg6[%c0_15, %c8] : memref<16x32xf32, #tpu.memory_space<vmem>>, vector<8x8xf32>
    tpu.vector_store %arg6[%c0_15, %c8], %51 {strides = array<i32>} : memref<16x32xf32, #tpu.memory_space<vmem>>, vector<8x8xf32>,
    %53 = vector.extract_strided_slice %3 {offsets = [0, 16], sizes = [8, 8], strides = [1, 1]} : vector<16x96xf32> to vector<8x8xf32>
    %54 = arith.truncf %53 : vector<8x8xf32> to vector<8x8xbf16>
    %55 = vector.extract_strided_slice %3 {offsets = [0, 48], sizes = [8, 8], strides = [1, 1]} : vector<16x96xf32> to vector<8x8xf32>
    %56 = arith.truncf %55 : vector<8x8xf32> to vector<8x8xbf16>
    %57 = vector.extract_strided_slice %3 {offsets = [0, 80], sizes = [8, 8], strides = [1, 1]} : vector<16x96xf32> to vector<8x8xf32>
    %58 = arith.truncf %57 : vector<8x8xf32> to vector<8x8xbf16>
    %59 = tpu.transpose %56, [1, 0] : vector<8x8xbf16> -> vector<8x8xbf16>
    %cst_16 = arith.constant dense<0.000000e+00> : vector<8x8xf32>
    %60 = tpu.matmul %54, %59, %cst_16 {dimension_numbers = #tpu.dot_dimension_numbers<[1], [0], [0], [1], [0, 0, 1, 1], [], []>} : vector<8x8xbf16>, vector<8x8xbf16>, vector<8x8xf32> -> vector<8x8xf32>
    %cst_17 = arith.constant -1.000000e+30 : f32
    %61 = vector.broadcast %cst_17 : f32 to vector<8x8xf32>
    %62 = arith.select %6, %60, %61 : vector<8x8xi1>, vector<8x8xf32>
    %cst_18 = arith.constant dense<0xFF800000> : vector<8xf32>
    %63 = vector.multi_reduction <maximumf>, %62, %cst_18 [1] : vector<8x8xf32> to vector<8xf32>
    %64 = vector.shape_cast %63 : vector<8xf32> to vector<8x1xf32>
    %65 = vector.broadcast %64 : vector<8x1xf32> to vector<8x8xf32>
    %66 = arith.subf %62, %65 : vector<8x8xf32>
    %67 = math.exp %66 : vector<8x8xf32>
    %cst_19 = arith.constant dense<0.000000e+00> : vector<8xf32>
    %68 = vector.multi_reduction <add>, %67, %cst_19 [1] : vector<8x8xf32> to vector<8xf32>
    %69 = vector.shape_cast %68 : vector<8xf32> to vector<8x1xf32>
    %70 = tpu.reciprocal %69 {approx = true} : vector<8x1xf32> -> vector<8x1xf32>
    %71 = vector.broadcast %70 : vector<8x1xf32> to vector<8x8xf32>
    %72 = arith.mulf %67, %71 : vector<8x8xf32>
    %73 = arith.truncf %72 : vector<8x8xf32> to vector<8x8xbf16>
    %cst_20 = arith.constant dense<0.000000e+00> : vector<8x8xf32>
    %74 = tpu.matmul %73, %58, %cst_20 {dimension_numbers = #tpu.dot_dimension_numbers<[1], [0], [0], [1], [0, 0, 1, 1], [], []>} : vector<8x8xbf16>, vector<8x8xbf16>, vector<8x8xf32> -> vector<8x8xf32>
    %c0_21 = arith.constant 0 : index
    %c16 = arith.constant 16 : index
    %75 = vector.load %arg6[%c0_21, %c16] : memref<16x32xf32, #tpu.memory_space<vmem>>, vector<8x8xf32>
    tpu.vector_store %arg6[%c0_21, %c16], %74 {strides = array<i32>} : memref<16x32xf32, #tpu.memory_space<vmem>>, vector<8x8xf32>,
    %76 = vector.extract_strided_slice %3 {offsets = [0, 24], sizes = [8, 8], strides = [1, 1]} : vector<16x96xf32> to vector<8x8xf32>
    %77 = arith.truncf %76 : vector<8x8xf32> to vector<8x8xbf16>
    %78 = vector.extract_strided_slice %3 {offsets = [0, 56], sizes = [8, 8], strides = [1, 1]} : vector<16x96xf32> to vector<8x8xf32>
    %79 = arith.truncf %78 : vector<8x8xf32> to vector<8x8xbf16>
    %80 = vector.extract_strided_slice %3 {offsets = [0, 88], sizes = [8, 8], strides = [1, 1]} : vector<16x96xf32> to vector<8x8xf32>
    %81 = arith.truncf %80 : vector<8x8xf32> to vector<8x8xbf16>
    %82 = tpu.transpose %79, [1, 0] : vector<8x8xbf16> -> vector<8x8xbf16>
    %cst_22 = arith.constant dense<0.000000e+00> : vector<8x8xf32>
    %83 = tpu.matmul %77, %82, %cst_22 {dimension_numbers = #tpu.dot_dimension_numbers<[1], [0], [0], [1], [0, 0, 1, 1], [], []>} : vector<8x8xbf16>, vector<8x8xbf16>, vector<8x8xf32> -> vector<8x8xf32>
    %cst_23 = arith.constant -1.000000e+30 : f32
    %84 = vector.broadcast %cst_23 : f32 to vector<8x8xf32>
    %85 = arith.select %6, %83, %84 : vector<8x8xi1>, vector<8x8xf32>
    %cst_24 = arith.constant dense<0xFF800000> : vector<8xf32>
    %86 = vector.multi_reduction <maximumf>, %85, %cst_24 [1] : vector<8x8xf32> to vector<8xf32>
    %87 = vector.shape_cast %86 : vector<8xf32> to vector<8x1xf32>
    %88 = vector.broadcast %87 : vector<8x1xf32> to vector<8x8xf32>
    %89 = arith.subf %85, %88 : vector<8x8xf32>
    %90 = math.exp %89 : vector<8x8xf32>
    %cst_25 = arith.constant dense<0.000000e+00> : vector<8xf32>
    %91 = vector.multi_reduction <add>, %90, %cst_25 [1] : vector<8x8xf32> to vector<8xf32>
    %92 = vector.shape_cast %91 : vector<8xf32> to vector<8x1xf32>
    %93 = tpu.reciprocal %92 {approx = true} : vector<8x1xf32> -> vector<8x1xf32>
    %94 = vector.broadcast %93 : vector<8x1xf32> to vector<8x8xf32>
    %95 = arith.mulf %90, %94 : vector<8x8xf32>
    %96 = arith.truncf %95 : vector<8x8xf32> to vector<8x8xbf16>
    %cst_26 = arith.constant dense<0.000000e+00> : vector<8x8xf32>
    %97 = tpu.matmul %96, %81, %cst_26 {dimension_numbers = #tpu.dot_dimension_numbers<[1], [0], [0], [1], [0, 0, 1, 1], [], []>} : vector<8x8xbf16>, vector<8x8xbf16>, vector<8x8xf32> -> vector<8x8xf32>
    %c0_27 = arith.constant 0 : index
    %c24 = arith.constant 24 : index
    %98 = vector.load %arg6[%c0_27, %c24] : memref<16x32xf32, #tpu.memory_space<vmem>>, vector<8x8xf32>
    tpu.vector_store %arg6[%c0_27, %c24], %97 {strides = array<i32>} : memref<16x32xf32, #tpu.memory_space<vmem>>, vector<8x8xf32>,
    %99 = vector.extract_strided_slice %3 {offsets = [8, 0], sizes = [8, 8], strides = [1, 1]} : vector<16x96xf32> to vector<8x8xf32>
    %100 = arith.truncf %99 : vector<8x8xf32> to vector<8x8xbf16>
    %101 = vector.extract_strided_slice %3 {offsets = [8, 32], sizes = [8, 8], strides = [1, 1]} : vector<16x96xf32> to vector<8x8xf32>
    %102 = arith.truncf %101 : vector<8x8xf32> to vector<8x8xbf16>
    %103 = vector.extract_strided_slice %3 {offsets = [8, 64], sizes = [8, 8], strides = [1, 1]} : vector<16x96xf32> to vector<8x8xf32>
    %104 = arith.truncf %103 : vector<8x8xf32> to vector<8x8xbf16>
    %105 = tpu.transpose %102, [1, 0] : vector<8x8xbf16> -> vector<8x8xbf16>
    %cst_28 = arith.constant dense<0.000000e+00> : vector<8x8xf32>
    %106 = tpu.matmul %100, %105, %cst_28 {dimension_numbers = #tpu.dot_dimension_numbers<[1], [0], [0], [1], [0, 0, 1, 1], [], []>} : vector<8x8xbf16>, vector<8x8xbf16>, vector<8x8xf32> -> vector<8x8xf32>
    %cst_29 = arith.constant -1.000000e+30 : f32
    %107 = vector.broadcast %cst_29 : f32 to vector<8x8xf32>
    %108 = arith.select %6, %106, %107 : vector<8x8xi1>, vector<8x8xf32>
    %cst_30 = arith.constant dense<0xFF800000> : vector<8xf32>
    %109 = vector.multi_reduction <maximumf>, %108, %cst_30 [1] : vector<8x8xf32> to vector<8xf32>
    %110 = vector.shape_cast %109 : vector<8xf32> to vector<8x1xf32>
    %111 = vector.broadcast %110 : vector<8x1xf32> to vector<8x8xf32>
    %112 = arith.subf %108, %111 : vector<8x8xf32>
    %113 = math.exp %112 : vector<8x8xf32>
    %cst_31 = arith.constant dense<0.000000e+00> : vector<8xf32>
    %114 = vector.multi_reduction <add>, %113, %cst_31 [1] : vector<8x8xf32> to vector<8xf32>
    %115 = vector.shape_cast %114 : vector<8xf32> to vector<8x1xf32>
    %116 = tpu.reciprocal %115 {approx = true} : vector<8x1xf32> -> vector<8x1xf32>
    %117 = vector.broadcast %116 : vector<8x1xf32> to vector<8x8xf32>
    %118 = arith.mulf %113, %117 : vector<8x8xf32>
    %119 = arith.truncf %118 : vector<8x8xf32> to vector<8x8xbf16>
    %cst_32 = arith.constant dense<0.000000e+00> : vector<8x8xf32>
    %120 = tpu.matmul %119, %104, %cst_32 {dimension_numbers = #tpu.dot_dimension_numbers<[1], [0], [0], [1], [0, 0, 1, 1], [], []>} : vector<8x8xbf16>, vector<8x8xbf16>, vector<8x8xf32> -> vector<8x8xf32>
    %c8_33 = arith.constant 8 : index
    %c0_34 = arith.constant 0 : index
    %121 = vector.load %arg6[%c8_33, %c0_34] : memref<16x32xf32, #tpu.memory_space<vmem>>, vector<8x8xf32>
    tpu.vector_store %arg6[%c8_33, %c0_34], %120 {strides = array<i32>} : memref<16x32xf32, #tpu.memory_space<vmem>>, vector<8x8xf32>,
    %122 = vector.extract_strided_slice %3 {offsets = [8, 8], sizes = [8, 8], strides = [1, 1]} : vector<16x96xf32> to vector<8x8xf32>
    %123 = arith.truncf %122 : vector<8x8xf32> to vector<8x8xbf16>
    %124 = vector.extract_strided_slice %3 {offsets = [8, 40], sizes = [8, 8], strides = [1, 1]} : vector<16x96xf32> to vector<8x8xf32>
    %125 = arith.truncf %124 : vector<8x8xf32> to vector<8x8xbf16>
    %126 = vector.extract_strided_slice %3 {offsets = [8, 72], sizes = [8, 8], strides = [1, 1]} : vector<16x96xf32> to vector<8x8xf32>
    %127 = arith.truncf %126 : vector<8x8xf32> to vector<8x8xbf16>
    %128 = tpu.transpose %125, [1, 0] : vector<8x8xbf16> -> vector<8x8xbf16>
    %cst_35 = arith.constant dense<0.000000e+00> : vector<8x8xf32>
    %129 = tpu.matmul %123, %128, %cst_35 {dimension_numbers = #tpu.dot_dimension_numbers<[1], [0], [0], [1], [0, 0, 1, 1], [], []>} : vector<8x8xbf16>, vector<8x8xbf16>, vector<8x8xf32> -> vector<8x8xf32>
    %cst_36 = arith.constant -1.000000e+30 : f32
    %130 = vector.broadcast %cst_36 : f32 to vector<8x8xf32>
    %131 = arith.select %6, %129, %130 : vector<8x8xi1>, vector<8x8xf32>
    %cst_37 = arith.constant dense<0xFF800000> : vector<8xf32>
    %132 = vector.multi_reduction <maximumf>, %131, %cst_37 [1] : vector<8x8xf32> to vector<8xf32>
    %133 = vector.shape_cast %132 : vector<8xf32> to vector<8x1xf32>
    %134 = vector.broadcast %133 : vector<8x1xf32> to vector<8x8xf32>
    %135 = arith.subf %131, %134 : vector<8x8xf32>
    %136 = math.exp %135 : vector<8x8xf32>
    %cst_38 = arith.constant dense<0.000000e+00> : vector<8xf32>
    %137 = vector.multi_reduction <add>, %136, %cst_38 [1] : vector<8x8xf32> to vector<8xf32>
    %138 = vector.shape_cast %137 : vector<8xf32> to vector<8x1xf32>
    %139 = tpu.reciprocal %138 {approx = true} : vector<8x1xf32> -> vector<8x1xf32>
    %140 = vector.broadcast %139 : vector<8x1xf32> to vector<8x8xf32>
    %141 = arith.mulf %136, %140 : vector<8x8xf32>
    %142 = arith.truncf %141 : vector<8x8xf32> to vector<8x8xbf16>
    %cst_39 = arith.constant dense<0.000000e+00> : vector<8x8xf32>
    %143 = tpu.matmul %142, %127, %cst_39 {dimension_numbers = #tpu.dot_dimension_numbers<[1], [0], [0], [1], [0, 0, 1, 1], [], []>} : vector<8x8xbf16>, vector<8x8xbf16>, vector<8x8xf32> -> vector<8x8xf32>
    %c8_40 = arith.constant 8 : index
    %c8_41 = arith.constant 8 : index
    %144 = vector.load %arg6[%c8_40, %c8_41] : memref<16x32xf32, #tpu.memory_space<vmem>>, vector<8x8xf32>
    tpu.vector_store %arg6[%c8_40, %c8_41], %143 {strides = array<i32>} : memref<16x32xf32, #tpu.memory_space<vmem>>, vector<8x8xf32>,
    %145 = vector.extract_strided_slice %3 {offsets = [8, 16], sizes = [8, 8], strides = [1, 1]} : vector<16x96xf32> to vector<8x8xf32>
    %146 = arith.truncf %145 : vector<8x8xf32> to vector<8x8xbf16>
    %147 = vector.extract_strided_slice %3 {offsets = [8, 48], sizes = [8, 8], strides = [1, 1]} : vector<16x96xf32> to vector<8x8xf32>
    %148 = arith.truncf %147 : vector<8x8xf32> to vector<8x8xbf16>
    %149 = vector.extract_strided_slice %3 {offsets = [8, 80], sizes = [8, 8], strides = [1, 1]} : vector<16x96xf32> to vector<8x8xf32>
    %150 = arith.truncf %149 : vector<8x8xf32> to vector<8x8xbf16>
    %151 = tpu.transpose %148, [1, 0] : vector<8x8xbf16> -> vector<8x8xbf16>
    %cst_42 = arith.constant dense<0.000000e+00> : vector<8x8xf32>
    %152 = tpu.matmul %146, %151, %cst_42 {dimension_numbers = #tpu.dot_dimension_numbers<[1], [0], [0], [1], [0, 0, 1, 1], [], []>} : vector<8x8xbf16>, vector<8x8xbf16>, vector<8x8xf32> -> vector<8x8xf32>
    %cst_43 = arith.constant -1.000000e+30 : f32
    %153 = vector.broadcast %cst_43 : f32 to vector<8x8xf32>
    %154 = arith.select %6, %152, %153 : vector<8x8xi1>, vector<8x8xf32>
    %cst_44 = arith.constant dense<0xFF800000> : vector<8xf32>
    %155 = vector.multi_reduction <maximumf>, %154, %cst_44 [1] : vector<8x8xf32> to vector<8xf32>
    %156 = vector.shape_cast %155 : vector<8xf32> to vector<8x1xf32>
    %157 = vector.broadcast %156 : vector<8x1xf32> to vector<8x8xf32>
    %158 = arith.subf %154, %157 : vector<8x8xf32>
    %159 = math.exp %158 : vector<8x8xf32>
    %cst_45 = arith.constant dense<0.000000e+00> : vector<8xf32>
    %160 = vector.multi_reduction <add>, %159, %cst_45 [1] : vector<8x8xf32> to vector<8xf32>
    %161 = vector.shape_cast %160 : vector<8xf32> to vector<8x1xf32>
    %162 = tpu.reciprocal %161 {approx = true} : vector<8x1xf32> -> vector<8x1xf32>
    %163 = vector.broadcast %162 : vector<8x1xf32> to vector<8x8xf32>
    %164 = arith.mulf %159, %163 : vector<8x8xf32>
    %165 = arith.truncf %164 : vector<8x8xf32> to vector<8x8xbf16>
    %cst_46 = arith.constant dense<0.000000e+00> : vector<8x8xf32>
    %166 = tpu.matmul %165, %150, %cst_46 {dimension_numbers = #tpu.dot_dimension_numbers<[1], [0], [0], [1], [0, 0, 1, 1], [], []>} : vector<8x8xbf16>, vector<8x8xbf16>, vector<8x8xf32> -> vector<8x8xf32>
    %c8_47 = arith.constant 8 : index
    %c16_48 = arith.constant 16 : index
    %167 = vector.load %arg6[%c8_47, %c16_48] : memref<16x32xf32, #tpu.memory_space<vmem>>, vector<8x8xf32>
    tpu.vector_store %arg6[%c8_47, %c16_48], %166 {strides = array<i32>} : memref<16x32xf32, #tpu.memory_space<vmem>>, vector<8x8xf32>,
    %168 = vector.extract_strided_slice %3 {offsets = [8, 24], sizes = [8, 8], strides = [1, 1]} : vector<16x96xf32> to vector<8x8xf32>
    %169 = arith.truncf %168 : vector<8x8xf32> to vector<8x8xbf16>
    %170 = vector.extract_strided_slice %3 {offsets = [8, 56], sizes = [8, 8], strides = [1, 1]} : vector<16x96xf32> to vector<8x8xf32>
    %171 = arith.truncf %170 : vector<8x8xf32> to vector<8x8xbf16>
    %172 = vector.extract_strided_slice %3 {offsets = [8, 88], sizes = [8, 8], strides = [1, 1]} : vector<16x96xf32> to vector<8x8xf32>
    %173 = arith.truncf %172 : vector<8x8xf32> to vector<8x8xbf16>
    %174 = tpu.transpose %171, [1, 0] : vector<8x8xbf16> -> vector<8x8xbf16>
    %cst_49 = arith.constant dense<0.000000e+00> : vector<8x8xf32>
    %175 = tpu.matmul %169, %174, %cst_49 {dimension_numbers = #tpu.dot_dimension_numbers<[1], [0], [0], [1], [0, 0, 1, 1], [], []>} : vector<8x8xbf16>, vector<8x8xbf16>, vector<8x8xf32> -> vector<8x8xf32>
    %cst_50 = arith.constant -1.000000e+30 : f32
    %176 = vector.broadcast %cst_50 : f32 to vector<8x8xf32>
    %177 = arith.select %6, %175, %176 : vector<8x8xi1>, vector<8x8xf32>
    %cst_51 = arith.constant dense<0xFF800000> : vector<8xf32>
    %178 = vector.multi_reduction <maximumf>, %177, %cst_51 [1] : vector<8x8xf32> to vector<8xf32>
    %179 = vector.shape_cast %178 : vector<8xf32> to vector<8x1xf32>
    %180 = vector.broadcast %179 : vector<8x1xf32> to vector<8x8xf32>
    %181 = arith.subf %177, %180 : vector<8x8xf32>
    %182 = math.exp %181 : vector<8x8xf32>
    %cst_52 = arith.constant dense<0.000000e+00> : vector<8xf32>
    %183 = vector.multi_reduction <add>, %182, %cst_52 [1] : vector<8x8xf32> to vector<8xf32>
    %184 = vector.shape_cast %183 : vector<8xf32> to vector<8x1xf32>
    %185 = tpu.reciprocal %184 {approx = true} : vector<8x1xf32> -> vector<8x1xf32>
    %186 = vector.broadcast %185 : vector<8x1xf32> to vector<8x8xf32>
    %187 = arith.mulf %182, %186 : vector<8x8xf32>
    %188 = arith.truncf %187 : vector<8x8xf32> to vector<8x8xbf16>
    %cst_53 = arith.constant dense<0.000000e+00> : vector<8x8xf32>
    %189 = tpu.matmul %188, %173, %cst_53 {dimension_numbers = #tpu.dot_dimension_numbers<[1], [0], [0], [1], [0, 0, 1, 1], [], []>} : vector<8x8xbf16>, vector<8x8xbf16>, vector<8x8xf32> -> vector<8x8xf32>
    %c8_54 = arith.constant 8 : index
    %c24_55 = arith.constant 24 : index
    %190 = vector.load %arg6[%c8_54, %c24_55] : memref<16x32xf32, #tpu.memory_space<vmem>>, vector<8x8xf32>
    tpu.vector_store %arg6[%c8_54, %c24_55], %189 {strides = array<i32>} : memref<16x32xf32, #tpu.memory_space<vmem>>, vector<8x8xf32>,
    %c0_56 = arith.constant 0 : index
    %c0_57 = arith.constant 0 : index
    %191 = vector.load %arg6[%c0_56, %c0_57] : memref<16x32xf32, #tpu.memory_space<vmem>>, vector<16x32xf32>
    %192 = arith.truncf %191 : vector<16x32xf32> to vector<16x32xbf16>
    %c0_58 = arith.constant 0 : index
    %c0_59 = arith.constant 0 : index
    %193 = vector.load %arg3[%c0_58, %c0_59] : memref<32x32xbf16, #tpu.memory_space<vmem>>, vector<32x32xbf16>
    %cst_60 = arith.constant dense<0.000000e+00> : vector<16x32xf32>
    %194 = tpu.matmul %192, %193, %cst_60 {dimension_numbers = #tpu.dot_dimension_numbers<[1], [0], [0], [1], [0, 0, 1, 1], [], []>} : vector<16x32xbf16>, vector<32x32xbf16>, vector<16x32xf32> -> vector<16x32xf32>
    %c0_61 = arith.constant 0 : index
    %c0_62 = arith.constant 0 : index
    %195 = vector.load %arg4[%c0_61, %c0_62] : memref<1x32xf32, #tpu.memory_space<vmem>>, vector<1x32xf32>
    %196 = vector.broadcast %195 : vector<1x32xf32> to vector<16x32xf32>
    %197 = arith.addf %194, %196 : vector<16x32xf32>
    %c0_63 = arith.constant 0 : index
    %c0_64 = arith.constant 0 : index
    %198 = vector.load %arg5[%c0_63, %c0_64] : memref<16x32xf32, #tpu.memory_space<vmem>>, vector<16x32xf32>
    tpu.vector_store %arg5[%c0_63, %c0_64], %197 {strides = array<i32>} : memref<16x32xf32, #tpu.memory_space<vmem>>, vector<16x32xf32>,
    return
  }
  func.func @transform_0(%arg0: i32) -> (i32, i32) {
    %c0_i32 = arith.constant 0 : i32
    %c0_i32_0 = arith.constant 0 : i32
    %c0_i32_1 = arith.constant 0 : i32
    return %c0_i32, %c0_i32_0 : i32, i32
  }
  func.func @transform_1(%arg0: i32) -> (i32, i32) {
    %c0_i32 = arith.constant 0 : i32
    %c0_i32_0 = arith.constant 0 : i32
    %c0_i32_1 = arith.constant 0 : i32
    return %c0_i32, %c0_i32_0 : i32, i32
  }
  func.func @transform_2(%arg0: i32) -> (i32, i32) {
    %c0_i32 = arith.constant 0 : i32
    %c0_i32_0 = arith.constant 0 : i32
    %c0_i32_1 = arith.constant 0 : i32
    return %c0_i32, %c0_i32_0 : i32, i32
  }
  func.func @transform_3(%arg0: i32) -> (i32, i32) {
    %c0_i32 = arith.constant 0 : i32
    %c0_i32_0 = arith.constant 0 : i32
    %c0_i32_1 = arith.constant 0 : i32
    return %c0_i32, %c0_i32_0 : i32, i32
  }
  func.func @transform_4(%arg0: i32) -> (i32, i32) {
    %c0_i32 = arith.constant 0 : i32
    %c0_i32_0 = arith.constant 0 : i32
    %c0_i32_1 = arith.constant 0 : i32
    return %c0_i32, %c0_i32_0 : i32, i32
  }
}

</mosaic_0001>

<bundles_post_ra>
// kernel: tpu_custom_call.1
= control target key start
LH: loop header
LB: loop body
LE: loop exit
PB: predicated region body
PF: predicated region fallthrough
CT: control target
= control target key end

     0   :  { %9 = vsyncpa [#allocation4], 0  ;;  %s1791_s0 = inlined_call_operand.hbm [shape: f32[16,32], index: 0, kind: input, shape index: {}]   ;;  %s1792_s1 = inlined_call_operand.hbm [shape: bf16[32,96], index: 1, kind: input, shape index: {}]   ;;  %s1793_s2 = inlined_call_operand.hbm [shape: bf16[32,32], index: 2, kind: input, shape index: {}]   ;;  %s1794_s3 = inlined_call_operand.vmem [shape: f32[1,32], index: 3, kind: input, shape index: {}]   ;;  %s1795_s4 = inlined_call_operand.hbm [shape: f32[16,32], index: 4, kind: output, shape index: {}]  }
   0x1   :  { %10 = vsyncpa [#allocation7], 0 }
   0x2   :  { %11 = vsyncpa [#allocation5], 0  ;;  %s1469_s15 = smov [#allocation6]   ;;  %s1375_s19 = scalar_lea.hbm %s1792_s1, 256 }
   0x3   :  { %s29_s16 = sshll.u32 %s1469_s15, 4  ;;  %p1376_p0 = scmp.ne.s32.totalorder %s1792_s1, %s1375_s19  ;;  %s30_s16 = int_to_ptr.vmem [resolvable:$true] %s29_s16 }
   0x4   :  { %p1379_p1 = scmp.lt.u32.totalorder %s1375_s19, %s1792_s1 }
   0x6   :  { %p1381_p2 = pnand %p1379_p1, %p1376_p0 }
   0x8   :  { %1384 = shalt.err (!%p1381_p2)
}
   0x9   :  { %s1385_s24 = scalar_lea.vmem %s30_s16, 256  ;;  %p1390_p4 = scmp.lt.s32.totalorder %s30_s16, %s30_s16 }
   0xa   :  { %p1386_p3 = scmp.ne.s32.totalorder %s30_s16, %s1385_s24  ;;  %p1391_p5 = scmp.lt.s32.totalorder %s1385_s24, %s1385_s24 }
   0xc   :  { %p1392_p6 = por %p1391_p5, %p1390_p4 }
   0xe   :  { %p1393_p7 = pnand %p1392_p6, %p1386_p3 }
  0x10   :  { %1396 = shalt.err (!%p1393_p7)
}
  0x11   :  { %s1470_s25 = smov 64   ;;  %s1471_s26 = smov 4  }
  0x12   :  { %35 = dma.hbm_to_vmem [thread:$0]  %s1792_s1, 256, %s30_s16, [#allocation7], %s1470_s25, %s1470_s25, %s1471_s26  }
  0x13   :  { %s1472_s29 = smov [#allocation3]   ;;  %s1397_s7 = scalar_lea.hbm %s1791_s0, 256 }
  0x14   :  { %s17_s30 = sshll.u32 %s1472_s29, 4  ;;  %p1398_p8 = scmp.ne.s32.totalorder %s1791_s0, %s1397_s7  ;;  %s18_s30 = int_to_ptr.vmem [resolvable:$true] %s17_s30 }
  0x15   :  { %p1401_p9 = scmp.lt.u32.totalorder %s1397_s7, %s1791_s0 }
  0x17   :  { %p1403_p10 = pnand %p1401_p9, %p1398_p8 }
  0x19   :  { %1406 = shalt.err (!%p1403_p10)
}
  0x1a   :  { %s1407_s12 = scalar_lea.vmem %s18_s30, 256  ;;  %p1412_p12 = scmp.lt.s32.totalorder %s18_s30, %s18_s30 }
  0x1b   :  { %p1408_p11 = scmp.ne.s32.totalorder %s18_s30, %s1407_s12  ;;  %p1413_p13 = scmp.lt.s32.totalorder %s1407_s12, %s1407_s12 }
  0x1d   :  { %p1414_p0 = por %p1413_p13, %p1412_p12 }
  0x1f   :  { %p1415_p1 = pnand %p1414_p0, %p1408_p11 }
  0x21   :  { %1418 = shalt.err (!%p1415_p1)
}
  0x22   :  { %s1473_s1 = smov 128   ;;  %s1474_s13 = smov 8  }
  0x23   :  { %23 = dma.hbm_to_vmem [thread:$0]  %s1791_s0, 256, %s18_s30, [#allocation4], %s1473_s1, %s1473_s1, %s1474_s13  }
  0x24   :  { %s1475_s16 = smov [#allocation8]   ;;  %s1419_s20 = scalar_lea.hbm %s1793_s2, 256 }
  0x25   :  { %s41_s17 = sshll.u32 %s1475_s16, 4  ;;  %p1420_p2 = scmp.ne.s32.totalorder %s1793_s2, %s1419_s20  ;;  %s42_s17 = int_to_ptr.vmem [resolvable:$true] %s41_s17 }
  0x26   :  { %p1423_p3 = scmp.lt.u32.totalorder %s1419_s20, %s1793_s2 }
  0x28   :  { %p1425_p4 = pnand %p1423_p3, %p1420_p2 }
  0x2a   :  { %1428 = shalt.err (!%p1425_p4)
}
  0x2b   :  { %s1429_s27 = scalar_lea.vmem %s42_s17, 256  ;;  %p1434_p6 = scmp.lt.s32.totalorder %s42_s17, %s42_s17 }
  0x2c   :  { %p1430_p5 = scmp.ne.s32.totalorder %s42_s17, %s1429_s27  ;;  %p1435_p7 = scmp.lt.s32.totalorder %s1429_s27, %s1429_s27 }
  0x2e   :  { %p1436_p8 = por %p1435_p7, %p1434_p6 }
  0x30   :  { %p1437_p9 = pnand %p1436_p8, %p1430_p5 }
  0x32   :  { %1440 = shalt.err (!%p1437_p9)
}
  0x33   :  { %47 = dma.hbm_to_vmem [thread:$0]  %s1793_s2, 256, %s42_s17, [#allocation7], %s1470_s25, %s1470_s25, %s1471_s26  }
  0x34   :  { %1463 = dma.done.wait [#allocation4], 256  }
  0x35   :  { %1464 = vsyncadd [#allocation4], 4294967040 }
  0x36   :  { %1465 = dma.done.wait [#allocation7], 512  }
  0x37   :  { %1466 = vsyncadd [#allocation7], 4294966784  ;;  %v1476_v0 = vmov 0.0   ;;  %vm1477_vm0 = vmmov 0   ;;  %v1339_v1 = vld [vmem:[#allocation6] sm:$0xff]   ;;  %v1340_v2 = vld [vmem:[#allocation6 + $0x8] sm:$0xff]   ;;  %v124_v34 = vlaneseq }
  0x38   :  { %1205 = vmatprep.subr.bf16.mxu0 %v1476_v0  ;;  %1209 = vmatprep.mubr.msk.bf16.mxu0 %vm1477_vm0, %v1476_v0  ;;  %v60_v3 = vld [vmem:[#allocation3] sm:$0xff]  ;;  %v61_v4 = vld [vmem:[#allocation3 + $0x8] sm:$0xff]  ;;  %vm79_vm1 = vcmask 261120   ;;  %s1478_s2 = smov 120   ;;  %s1479_s26 = smov 96   ;;  %vm133_vm2 = vcmask 64512  }
  0x39   :  { %1213 = vmatprep.subr.bf16.mxu1 %v1476_v0  ;;  %1215 = vmatprep.mubr.msk.bf16.mxu1 %vm1477_vm0, %v1476_v0  ;;  %v62_v5 = vpack.c.bf16 %v61_v4, %v60_v3  ;;  %s1480_s29 = smov 80   ;;  %s1481_s30 = smov 88   ;;  %v125_v35 = vshrl.u32 %v124_v34, 7  ;;  %v127_v36 = vand.u32 127, %v124_v34  ;;  %vm198_vm4 = vcmask 1043456  }
  0x3a   :  { %1206 = vmatpush3.bf16.msra.mxu0 %v1339_v1  ;;  %s1482_s5 = smov 72   ;;  %s1483_s6 = smov 112   ;;  %vm358_vm5 = vcmask 130112   ;;  %vm475_vm6 = vcmask 195712   ;;  %vm592_vm7 = vcmask 261312  }
  0x3b   :  { %1207 = vmatprep.subr.bf16.mxu0 %v1476_v0  ;;  %s1484_s7 = smov 104   ;;  %vm1632_vm3 = vcmp.ge.s32.totalorder %v125_v35, %v127_v36  ;;  %s1485_s8 = smov 56  }
  0x3c   :  { %s1486_s9 = smov 48   ;;  %s1487_s10 = smov 40  }
  0x3d   :  { %s1489_s11 = smov 24   ;;  %s1490_s15 = smov [#allocation9]  }
  0x3e   :  { %1208 = vmatpush3.bf16.msra.mxu0 %v1340_v2  ;;  %s1131_s16 = sshll.u32 %s1490_s15, 4  ;;  %s1132_s16 = int_to_ptr.vmem [resolvable:$true] %s1131_s16 }
  0x3f   :  { %1219 = vmatprep.subr.bf16.mxu0 %v1476_v0  ;;  %s1441_s17 = scalar_lea.vmem %s1132_s16, 256  ;;  %p1446_p11 = scmp.lt.s32.totalorder %s1132_s16, %s1132_s16 }
  0x40   :  { %p1442_p10 = scmp.ne.s32.totalorder %s1132_s16, %s1441_s17  ;;  %p1447_p12 = scmp.lt.s32.totalorder %s1441_s17, %s1441_s17 }
  0x41   :  { %1210 = vmatmul.mubr.msk.bf16.vlgmr.msra.gmra.mrb[0].mxu0 %vm79_vm1, %v62_v5 }
  0x42   :  { %1221 = vmatprep.mubr.msk.bf16.mxu0 %vm1477_vm0, %v1476_v0  ;;  %p1448_p13 = por %p1447_p12, %p1446_p11 }
  0x44   :  { %p1449_p0 = pnand %p1448_p13, %p1442_p10 }
 0x114   :  { %v117_v6 = vpop.f32.mrb[0].mxu0 }
 0x115   :  { %v1572_v7 = vpack.c.bf16 %v117_v6, %v117_v6  ;;  %v1211_v8 = vpop.f32.mrb[1].mxu0 }
 0x116   :  { %v120_v9 = vpop.f32.mrb[2].mxu0 }
 0x117   :  { %243 = vrot.lane.b32.xlu1 %v1572_v7, %s1478_s2  ;;  %131 = vrot.lane.b32.xlu0 %v1572_v7, %s1479_s26  ;;  %v1212_v10 = vpop.f32.mrb[3].mxu0  ;;  %v1580_v11 = vpack.c.bf16 %v120_v9, %v120_v9 }
 0x11b   :  { %362 = vrot.lane.b32.xlu1 %v1572_v7, %s1480_s29  ;;  %245 = vrot.lane.b32.xlu0 %v1572_v7, %s1481_s30 }
 0x11f   :  { %479 = vrot.lane.b32.xlu1 %v1572_v7, %s1482_s5  ;;  %360 = vrot.lane.b32.xlu0 %v1572_v7, %s1483_s6 }
 0x123   :  { %477 = vrot.lane.b32.xlu0 %v1572_v7, %s1484_s7  ;;  %596 = vrot.lane.b32.xlu1 %v1580_v11, %s1479_s26 }
 0x127   :  { %708 = vrot.lane.b32.xlu0 %v1580_v11, %s1481_s30  ;;  %706 = vrot.lane.b32.xlu1 %v1580_v11, %s1478_s2 }
 0x12b   :  { %824 = vrot.lane.b32.xlu0 %v1580_v11, %s1480_s29  ;;  %822 = vrot.lane.b32.xlu1 %v1580_v11, %s1483_s6 }
 0x12f   :  { %940 = vrot.lane.b32.xlu0 %v1580_v11, %s1482_s5  ;;  %938 = vrot.lane.b32.xlu1 %v1580_v11, %s1484_s7 }
 0x189   :  { %v132_v12 = vpop.permute.xlu0 %131  ;;  %v244_v15 = vpop.permute.xlu1 %243 }
 0x18a   :  { %v138_v13 = vsel %vm133_vm2, %v132_v12, 0 }
 0x18b   :  { %1214 = vmatpush3.bf16.xpose.msra.mxu1 %v138_v13 }
 0x18c   :  { %1225 = vmatprep.subr.bf16.mxu1 %v1476_v0 }
 0x18d   :  { %v246_v14 = vpop.permute.xlu0 %245  ;;  %v363_v17 = vpop.permute.xlu1 %362 }
 0x18e   :  { %v251_v16 = vsel %vm133_vm2, %v246_v14, 0  ;;  %v368_v18 = vsel %vm133_vm2, %v363_v17, 0 }
 0x191   :  { %v480_v19 = vpop.permute.xlu1 %479  ;;  %v361_v20 = vpop.permute.xlu0 %360 }
 0x192   :  { %1216 = vmatmul.mubr.msk.bf16.vlgmr.msra.gmra.mrb[0].mxu1 %vm133_vm2, %v1572_v7  ;;  %v485_v21 = vsel %vm133_vm2, %v480_v19, 0 }
 0x193   :  { %1226 = vmatpush3.bf16.xpose.msra.mxu1 %v251_v16  ;;  %1227 = vmatprep.mubr.msk.bf16.mxu1 %vm1477_vm0, %v1476_v0 }
 0x194   :  { %1237 = vmatprep.subr.bf16.mxu1 %v1476_v0 }
 0x195   :  { %v597_v22 = vpop.permute.xlu1 %596  ;;  %v478_v23 = vpop.permute.xlu0 %477 }
 0x196   :  { %v602_v24 = vsel %vm133_vm2, %v597_v22, 0 }
 0x199   :  { %v709_v25 = vpop.permute.xlu0 %708  ;;  %v707_v28 = vpop.permute.xlu1 %706 }
 0x19a   :  { %1228 = vmatmul.mubr.msk.bf16.vlgmr.msra.gmra.mrb[4].mxu1 %vm133_vm2, %v244_v15  ;;  %v714_v26 = vsel %vm133_vm2, %v709_v25, 0 }
 0x19b   :  { %1238 = vmatpush3.bf16.xpose.msra.mxu1 %v368_v18  ;;  %1239 = vmatprep.mubr.msk.bf16.mxu1 %vm1477_vm0, %v1476_v0 }
 0x19c   :  { %1249 = vmatprep.subr.bf16.mxu1 %v1476_v0 }
 0x19d   :  { %v825_v27 = vpop.permute.xlu0 %824  ;;  %v823_v31 = vpop.permute.xlu1 %822 }
 0x19e   :  { %v830_v29 = vsel %vm133_vm2, %v825_v27, 0 }
 0x1a1   :  { %v941_v30 = vpop.permute.xlu0 %940  ;;  %v939_v33 = vpop.permute.xlu1 %938 }
 0x1a2   :  { %1240 = vmatmul.mubr.msk.bf16.vlgmr.msra.gmra.mrb[8].mxu1 %vm133_vm2, %v361_v20  ;;  %v946_v32 = vsel %vm133_vm2, %v941_v30, 0 }
 0x1a3   :  { %1250 = vmatpush3.bf16.xpose.msra.mxu1 %v485_v21  ;;  %1251 = vmatprep.mubr.msk.bf16.mxu1 %vm1477_vm0, %v1476_v0 }
 0x1a4   :  { %1261 = vmatprep.subr.bf16.mxu1 %v1476_v0 }
 0x1aa   :  { %1252 = vmatmul.mubr.msk.bf16.vlgmr.msra.gmra.mrb[12].mxu1 %vm133_vm2, %v478_v23 }
 0x1ab   :  { %1262 = vmatpush3.bf16.xpose.msra.mxu1 %v602_v24  ;;  %1263 = vmatprep.mubr.msk.bf16.mxu1 %vm1477_vm0, %v1476_v0 }
 0x1ac   :  { %1273 = vmatprep.subr.bf16.mxu1 %v1476_v0 }
 0x1b2   :  { %1264 = vmatmul.mubr.msk.bf16.vlgmr.msra.gmra.mrb[16].mxu1 %vm133_vm2, %v1580_v11 }
 0x1b3   :  { %1274 = vmatpush3.bf16.xpose.msra.mxu1 %v714_v26  ;;  %1275 = vmatprep.mubr.msk.bf16.mxu1 %vm1477_vm0, %v1476_v0 }
 0x1b4   :  { %1285 = vmatprep.subr.bf16.mxu1 %v1476_v0 }
 0x1ba   :  { %1276 = vmatmul.mubr.msk.bf16.vlgmr.msra.gmra.mrb[20].mxu1 %vm133_vm2, %v707_v28 }
 0x1bb   :  { %1286 = vmatpush3.bf16.xpose.msra.mxu1 %v830_v29  ;;  %1287 = vmatprep.mubr.msk.bf16.mxu1 %vm1477_vm0, %v1476_v0 }
 0x1bc   :  { %1297 = vmatprep.subr.bf16.mxu1 %v1476_v0 }
 0x1c2   :  { %1288 = vmatmul.mubr.msk.bf16.vlgmr.msra.gmra.mrb[24].mxu1 %vm133_vm2, %v823_v31 }
 0x1c3   :  { %1298 = vmatpush3.bf16.xpose.msra.mxu1 %v946_v32  ;;  %1299 = vmatprep.mubr.msk.bf16.mxu1 %vm1477_vm0, %v1476_v0 }
 0x1c4   :  { %1309 = vmatprep.subr.bf16.mxu1 %v1476_v0 }
 0x1ca   :  { %1300 = vmatmul.mubr.msk.bf16.vlgmr.msra.gmra.mrb[28].mxu1 %vm133_vm2, %v939_v33 }
 0x1cb   :  { %1313 = vmatprep.mubr.msk.bf16.mxu1 %vm1477_vm0, %v1476_v0 }
 0x265   :  { %v174_v38 = vpop.f32.mrb[0].mxu1 }
 0x266   :  { %v180_v39 = vsel %vm1632_vm3, %v174_v38, -1e+30  ;;  %v1217_v40 = vpop.f32.mrb[1].mxu1 }
 0x267   :  { %v177_v41 = vpop.f32.mrb[2].mxu1  ;;  %v181_v42 = vsel %vm133_vm2, %v180_v39, -inf }
 0x268   :  { %v1218_v43 = vpop.f32.mrb[3].mxu1  ;;  %182 = vmax.xlane.f32.xlu0 %v181_v42 }
 0x26d   :  { %v287_v44 = vpop.f32.mrb[4].mxu1 }
 0x26e   :  { %v293_v45 = vsel %vm1632_vm3, %v287_v44, -1e+30  ;;  %v1229_v46 = vpop.f32.mrb[5].mxu1 }
 0x26f   :  { %v290_v47 = vpop.f32.mrb[6].mxu1  ;;  %v294_v48 = vsel %vm133_vm2, %v293_v45, -inf }
 0x270   :  { %v1230_v49 = vpop.f32.mrb[7].mxu1  ;;  %295 = vmax.xlane.f32.xlu1 %v294_v48 }
 0x275   :  { %v404_v50 = vpop.f32.mrb[8].mxu1 }
 0x276   :  { %v410_v51 = vsel %vm1632_vm3, %v404_v50, -1e+30  ;;  %v1241_v52 = vpop.f32.mrb[9].mxu1 }
 0x277   :  { %v407_v53 = vpop.f32.mrb[10].mxu1  ;;  %v411_v54 = vsel %vm133_vm2, %v410_v51, -inf }
 0x278   :  { %v1242_v55 = vpop.f32.mrb[11].mxu1  ;;  %412 = vmax.xlane.f32.xlu0 %v411_v54 }
 0x27d   :  { %v521_v56 = vpop.f32.mrb[12].mxu1 }
 0x27e   :  { %v1647_v57 = vsel %vm1632_vm3, %v521_v56, -1e+30  ;;  %v1253_v58 = vpop.f32.mrb[13].mxu1 }
 0x27f   :  { %v524_v59 = vpop.f32.mrb[14].mxu1  ;;  %v528_v60 = vsel %vm133_vm2, %v1647_v57, -inf }
 0x280   :  { %v1254_v61 = vpop.f32.mrb[15].mxu1  ;;  %529 = vmax.xlane.f32.xlu0 %v528_v60 }
 0x285   :  { %v638_v62 = vpop.f32.mrb[16].mxu1 }
 0x286   :  { %v1653_v63 = vsel %vm1632_vm3, %v638_v62, -1e+30  ;;  %v1265_v1 = vpop.f32.mrb[17].mxu1 }
 0x287   :  { %v641_v2 = vpop.f32.mrb[18].mxu1  ;;  %v645_v3 = vsel %vm133_vm2, %v1653_v63, -inf }
 0x288   :  { %646 = vmax.xlane.f32.xlu1 %v645_v3  ;;  %v1266_v4 = vpop.f32.mrb[19].mxu1 }
 0x28d   :  { %v750_v5 = vpop.f32.mrb[20].mxu1 }
 0x28e   :  { %v1659_v6 = vsel %vm1632_vm3, %v750_v5, -1e+30  ;;  %v1277_v8 = vpop.f32.mrb[21].mxu1 }
 0x28f   :  { %v753_v9 = vpop.f32.mrb[22].mxu1  ;;  %v757_v10 = vsel %vm133_vm2, %v1659_v6, -inf }
 0x290   :  { %758 = vmax.xlane.f32.xlu0 %v757_v10  ;;  %v1278_v12 = vpop.f32.mrb[23].mxu1 }
 0x295   :  { %v866_v13 = vpop.f32.mrb[24].mxu1 }
 0x296   :  { %v872_v14 = vsel %vm1632_vm3, %v866_v13, -1e+30  ;;  %v1289_v15 = vpop.f32.mrb[25].mxu1 }
 0x297   :  { %v869_v16 = vpop.f32.mrb[26].mxu1  ;;  %v873_v17 = vsel %vm133_vm2, %v872_v14, -inf }
 0x298   :  { %874 = vmax.xlane.f32.xlu1 %v873_v17  ;;  %v1290_v18 = vpop.f32.mrb[27].mxu1 }
 0x29d   :  { %v982_v19 = vpop.f32.mrb[28].mxu1 }
 0x29e   :  { %v1668_v20 = vsel %vm1632_vm3, %v982_v19, -1e+30  ;;  %v1301_v21 = vpop.f32.mrb[29].mxu1 }
 0x29f   :  { %v985_v22 = vpop.f32.mrb[30].mxu1  ;;  %v989_v24 = vsel %vm133_vm2, %v1668_v20, -inf }
 0x2a0   :  { %v1302_v23 = vpop.f32.mrb[31].mxu1 }
 0x2a6   :  { %306 = vrot.lane.b32.xlu0 %v1572_v7, %s1485_s8 }
 0x2a9   :  { %193 = vrot.lane.b32.xlu1 %v1572_v7, %s1470_s25 }
 0x2c5   :  { %990 = vmax.xlane.f32.xlu0 %v989_v24 }
 0x2f5   :  { %v183_v25 = vpop.xlane.xlu0 %182 }
 0x2f6   :  { %v184_v26 = vsub.f32 %v180_v39, %v183_v25 }
 0x2f8   :  { %v185_v27 = vmul.f32 1.442695, %v184_v26 }
 0x2fa   :  { %1343 = vpow2.f32 %v185_v27 }
 0x2fd   :  { %v296_v28 = vpop.xlane.xlu1 %295 }
 0x2fe   :  { %v297_v29 = vsub.f32 %v293_v45, %v296_v28 }
 0x300   :  { %v298_v30 = vmul.f32 1.442695, %v297_v29 }
 0x302   :  { %1345 = vpow2.f32 %v298_v30 }
 0x304   :  { %v1676_v31 = vpop.eup %1343 }
 0x305   :  { %v413_v32 = vpop.xlane.xlu0 %412  ;;  %v187_v33 = vsel %vm133_vm2, %v1676_v31, 0.0 }
 0x306   :  { %v414_v34 = vsub.f32 %v410_v51, %v413_v32  ;;  %188 = vadd.xlane.f32.xlu1 %v187_v33 }
 0x308   :  { %v415_v35 = vmul.f32 1.442695, %v414_v34 }
 0x30a   :  { %1347 = vpow2.f32 %v415_v35 }
 0x30c   :  { %v1680_v36 = vpop.eup %1345 }
 0x30d   :  { %v300_v37 = vsel %vm133_vm2, %v1680_v36, 0.0  ;;  %v530_v43 = vpop.xlane.xlu0 %529 }
 0x30e   :  { %301 = vadd.xlane.f32.xlu0 %v300_v37  ;;  %v531_v45 = vsub.f32 %v1647_v57, %v530_v43 }
 0x310   :  { %v532_v46 = vmul.f32 1.442695, %v531_v45 }
 0x312   :  { %1349 = vpow2.f32 %v532_v46 }
 0x314   :  { %v1684_v38 = vpop.eup %1347 }
 0x315   :  { %v417_v39 = vsel %vm133_vm2, %v1684_v38, 0.0  ;;  %v647_v40 = vpop.xlane.xlu1 %646 }
 0x316   :  { %418 = vadd.xlane.f32.xlu1 %v417_v39  ;;  %v648_v47 = vsub.f32 %v1653_v63, %v647_v40 }
 0x318   :  { %v649_v50 = vmul.f32 1.442695, %v648_v47 }
 0x31a   :  { %1351 = vpow2.f32 %v649_v50 }
 0x31c   :  { %v1350_v53 = vpop.eup %1349 }
 0x31d   :  { %v759_v48 = vpop.xlane.xlu0 %758  ;;  %v534_v54 = vsel %vm133_vm2, %v1350_v53, 0.0 }
 0x31e   :  { %v760_v49 = vsub.f32 %v1659_v6, %v759_v48 }
 0x321   :  { %v307_v61 = vpop.permute.xlu0 %306 }
 0x322   :  { %v312_v10 = vsel %vm198_vm4, %v307_v61, 0 }
 0x324   :  { %423 = vrot.lane.b32.xlu0 %v1572_v7, %s1486_s9  ;;  %v1698_v55 = vpop.eup %1351 }
 0x325   :  { %v875_v41 = vpop.xlane.xlu1 %874  ;;  %v651_v57 = vsel %vm133_vm2, %v1698_v55, 0.0 }
 0x326   :  { %v876_v51 = vsub.f32 %v872_v14, %v875_v41 }
 0x327   :  { %540 = vrot.lane.b32.xlu1 %v1572_v7, %s1487_s10  ;;  %v761_v7 = vmul.f32 1.442695, %v760_v49 }
 0x328   :  { %v877_v52 = vmul.f32 1.442695, %v876_v51 }
 0x329   :  { %v194_v42 = vpop.permute.xlu1 %193  ;;  %1353 = vpow2.f32 %v761_v7 }
 0x32a   :  { %v200_v44 = vsel %vm198_vm4, %v194_v42, 0  ;;  %1355 = vpow2.f32 %v877_v52 }
 0x32b   :  { %1220 = vmatpush3.bf16.msra.mxu0 %v200_v44 }
 0x32c   :  { %1231 = vmatprep.subr.bf16.mxu0 %v1476_v0 }
 0x333   :  { %v1700_v56 = vpop.eup %1353 }
 0x334   :  { %v1704_v58 = vpop.eup %1355  ;;  %v763_v59 = vsel %vm133_vm2, %v1700_v56, 0.0 }
 0x335   :  { %v879_v60 = vsel %vm133_vm2, %v1704_v58, 0.0 }
 0x343   :  { %535 = vadd.xlane.f32.xlu0 %v534_v54 }
 0x347   :  { %652 = vadd.xlane.f32.xlu0 %v651_v57 }
 0x34b   :  { %764 = vadd.xlane.f32.xlu1 %v763_v59  ;;  %880 = vadd.xlane.f32.xlu0 %v879_v60 }
 0x352   :  { %v991_v62 = vpop.xlane.xlu0 %990 }
 0x353   :  { %v992_v63 = vsub.f32 %v1668_v20, %v991_v62 }
 0x355   :  { %v993_v1 = vmul.f32 1.442695, %v992_v63 }
 0x357   :  { %1357 = vpow2.f32 %v993_v1 }
 0x35c   :  { %769 = vrot.lane.b32.xlu1 %v1580_v11, %s1485_s8 }
 0x360   :  { %885 = vrot.lane.b32.xlu1 %v1580_v11, %s1486_s9 }
 0x361   :  { %v1715_v2 = vpop.eup %1357 }
 0x362   :  { %v995_v3 = vsel %vm133_vm2, %v1715_v2, 0.0 }
 0x363   :  { %996 = vadd.xlane.f32.xlu0 %v995_v3 }
 0x364   :  { %1001 = vrot.lane.b32.xlu1 %v1580_v11, %s1487_s10 }
 0x379   :  { %657 = vrot.lane.b32.xlu0 %v1580_v11, %s1470_s25  ;;  %s1488_s25 = smov 16  }
 0x393   :  { %v189_v4 = vpop.xlane.xlu1 %188 }
 0x394   :  { %1359 = vrcp.f32 %v189_v4 }
 0x39b   :  { %v302_v5 = vpop.xlane.xlu0 %301 }
 0x39c   :  { %1361 = vrcp.f32 %v302_v5 }
 0x39e   :  { %v1360_v6 = vpop.eup %1359 }
 0x39f   :  { %v191_v8 = vmul.f32 %v1360_v6, %v1676_v31  ;;  %v424_v14 = vpop.permute.xlu0 %423 }
 0x3a0   :  { %v429_v16 = vsel %vm198_vm4, %v424_v14, 0 }
 0x3a1   :  { %v192_v9 = vpack.c.bf16 %v191_v8, %v191_v8 }
 0x3a3   :  { %1222 = vmatmul.mubr.msk.bf16.vlgmr.msra.gmra.mrb[4].mxu0 %vm133_vm2, %v192_v9  ;;  %v419_v12 = vpop.xlane.xlu1 %418 }
 0x3a4   :  { %1232 = vmatpush3.bf16.msra.mxu0 %v312_v10  ;;  %1363 = vrcp.f32 %v419_v12  ;;  %1233 = vmatprep.mubr.msk.bf16.mxu0 %vm1477_vm0, %v1476_v0  ;;  %v1341_v12 = vld [vmem:[#allocation8] sm:$0xff]  }
 0x3a5   :  { %1243 = vmatprep.subr.bf16.mxu0 %v1476_v0  ;;  %1310 = vmatpush3.bf16.msra.mxu1 %v1341_v12 }
 0x3a6   :  { %v1362_v11 = vpop.eup %1361  ;;  %1311 = vmatprep.subr.bf16.mxu1 %v1476_v0 }
 0x3a7   :  { %v304_v13 = vmul.f32 %v1362_v11, %v1680_v36  ;;  %v541_v19 = vpop.permute.xlu1 %540  ;;  %v1342_v11 = vld [vmem:[#allocation8 + $0x8] sm:$0xff]  }
 0x3a8   :  { %v546_v21 = vsel %vm198_vm4, %v541_v19, 0 }
 0x3a9   :  { %v305_v15 = vpack.c.bf16 %v304_v13, %v304_v13  ;;  %1312 = vmatpush3.bf16.msra.mxu1 %v1342_v11 }
 0x3ab   :  { %1234 = vmatmul.mubr.msk.bf16.vlgmr.msra.gmra.mrb[8].mxu0 %vm133_vm2, %v305_v15 }
 0x3ac   :  { %1244 = vmatpush3.bf16.msra.mxu0 %v429_v16  ;;  %1245 = vmatprep.mubr.msk.bf16.mxu0 %vm1477_vm0, %v1476_v0 }
 0x3ad   :  { %1255 = vmatprep.subr.bf16.mxu0 %v1476_v0 }
 0x3ae   :  { %v1364_v17 = vpop.eup %1363 }
 0x3af   :  { %v421_v18 = vmul.f32 %v1364_v17, %v1684_v38 }
 0x3b1   :  { %v422_v20 = vpack.c.bf16 %v421_v18, %v421_v18 }
 0x3b3   :  { %1246 = vmatmul.mubr.msk.bf16.vlgmr.msra.gmra.mrb[12].mxu0 %vm133_vm2, %v422_v20 }
 0x3b4   :  { %1256 = vmatpush3.bf16.msra.mxu0 %v546_v21  ;;  %1257 = vmatprep.mubr.msk.bf16.mxu0 %vm1477_vm0, %v1476_v0 }
 0x3b5   :  { %1267 = vmatprep.subr.bf16.mxu0 %v1476_v0 }
 0x3d0   :  { %v536_v22 = vpop.xlane.xlu0 %535 }
 0x3d1   :  { %1365 = vrcp.f32 %v536_v22 }
 0x3d4   :  { %v653_v26 = vpop.xlane.xlu0 %652 }
 0x3d5   :  { %1367 = vrcp.f32 %v653_v26 }
 0x3d8   :  { %v765_v27 = vpop.xlane.xlu1 %764  ;;  %v881_v28 = vpop.xlane.xlu0 %880 }
 0x3d9   :  { %1369 = vrcp.f32 %v765_v27 }
 0x3da   :  { %1371 = vrcp.f32 %v881_v28 }
 0x3db   :  { %v1366_v23 = vpop.eup %1365 }
 0x3dc   :  { %v538_v24 = vmul.f32 %v1366_v23, %v1350_v53  ;;  %v770_v34 = vpop.permute.xlu1 %769 }
 0x3dd   :  { %v775_v37 = vsel %vm198_vm4, %v770_v34, 0 }
 0x3de   :  { %v539_v25 = vpack.c.bf16 %v538_v24, %v538_v24 }
 0x3df   :  { %v1368_v29 = vpop.eup %1367 }
 0x3e0   :  { %1258 = vmatmul.mubr.msk.bf16.vlgmr.msra.gmra.mrb[16].mxu0 %vm133_vm2, %v539_v25  ;;  %v655_v31 = vmul.f32 %v1368_v29, %v1698_v55  ;;  %v886_v39 = vpop.permute.xlu1 %885  ;;  %v1163_v29 = vld [vmem:[%s1794_s3] ss:$0 sm:$0xff] }
 0x3e1   :  { %1269 = vmatprep.mubr.msk.bf16.mxu0 %vm1477_vm0, %v1476_v0  ;;  %v891_v42 = vsel %vm198_vm4, %v886_v39, 0 }
 0x3e2   :  { %v656_v35 = vpack.c.bf16 %v655_v31, %v655_v31 }
 0x3e3   :  { %v1370_v36 = vpop.eup %1369 }
 0x3e4   :  { %v767_v38 = vmul.f32 %v1370_v36, %v1700_v56  ;;  %v1372_v41 = vpop.eup %1371  ;;  %v1002_v44 = vpop.permute.xlu1 %1001 }
 0x3e5   :  { %v883_v43 = vmul.f32 %v1372_v41, %v1704_v58  ;;  %v1007_v47 = vsel %vm198_vm4, %v1002_v44, 0 }
 0x3e6   :  { %v768_v40 = vpack.c.bf16 %v767_v38, %v767_v38 }
 0x3e7   :  { %v884_v45 = vpack.c.bf16 %v883_v43, %v883_v43 }
 0x3f0   :  { %v997_v30 = vpop.xlane.xlu0 %996 }
 0x3f1   :  { %1373 = vrcp.f32 %v997_v30 }
 0x3f4   :  { %v658_v32 = vpop.permute.xlu0 %657 }
 0x3f5   :  { %v663_v33 = vsel %vm198_vm4, %v658_v32, 0 }
 0x3f6   :  { %1268 = vmatpush3.bf16.msra.mxu0 %v663_v33 }
 0x3f7   :  { %1279 = vmatprep.subr.bf16.mxu0 %v1476_v0 }
 0x3f9   :  { %1270 = vmatmul.mubr.msk.bf16.vlgmr.msra.gmra.mrb[20].mxu0 %vm133_vm2, %v656_v35 }
 0x3fa   :  { %1280 = vmatpush3.bf16.msra.mxu0 %v775_v37  ;;  %1281 = vmatprep.mubr.msk.bf16.mxu0 %vm1477_vm0, %v1476_v0 }
 0x3fb   :  { %1291 = vmatprep.subr.bf16.mxu0 %v1476_v0  ;;  %v1374_v46 = vpop.eup %1373 }
 0x3fc   :  { %v999_v48 = vmul.f32 %v1374_v46, %v1715_v2 }
 0x3fe   :  { %v1000_v49 = vpack.c.bf16 %v999_v48, %v999_v48 }
 0x401   :  { %1282 = vmatmul.mubr.msk.bf16.vlgmr.msra.gmra.mrb[24].mxu0 %vm133_vm2, %v768_v40 }
 0x402   :  { %1292 = vmatpush3.bf16.msra.mxu0 %v891_v42  ;;  %1293 = vmatprep.mubr.msk.bf16.mxu0 %vm1477_vm0, %v1476_v0 }
 0x403   :  { %1303 = vmatprep.subr.bf16.mxu0 %v1476_v0 }
 0x409   :  { %1294 = vmatmul.mubr.msk.bf16.vlgmr.msra.gmra.mrb[28].mxu0 %vm133_vm2, %v884_v45 }
 0x40a   :  { %1304 = vmatpush3.bf16.msra.mxu0 %v1007_v47  ;;  %1305 = vmatprep.mubr.msk.bf16.mxu0 %vm1477_vm0, %v1476_v0 }
 0x411   :  { %1306 = vmatmul.mubr.msk.bf16.vlgmr.msra.gmra.mrb[32].mxu0 %vm133_vm2, %v1000_v49 }
 0x476   :  { %v236_v50 = vpop.f32.mrb[4].mxu0 }
 0x477   :  { %242 = vst.msk [vmem:[#allocation2] sm:$0xff] %vm133_vm2, %v236_v50  ;;  %v1223_v51 = vpop.f32.mrb[5].mxu0 }
 0x478   :  { %v239_v7 = vpop.f32.mrb[6].mxu0 }
 0x479   :  { %v1224_v52 = vpop.f32.mrb[7].mxu0 }
 0x47e   :  { %v348_v53 = vpop.f32.mrb[8].mxu0 }
 0x47f   :  { %355 = vrot.lane.b32.xlu1 %v348_v53, %s1474_s13  ;;  %v1235_v54 = vpop.f32.mrb[9].mxu0 }
 0x480   :  { %v351_v55 = vpop.f32.mrb[10].mxu0 }
 0x481   :  { %v1236_v56 = vpop.f32.mrb[11].mxu0 }
 0x486   :  { %v465_v57 = vpop.f32.mrb[12].mxu0 }
 0x487   :  { %472 = vrot.lane.b32.xlu0 %v465_v57, %s1488_s25  ;;  %v1247_v58 = vpop.f32.mrb[13].mxu0 }
 0x488   :  { %v468_v59 = vpop.f32.mrb[14].mxu0 }
 0x489   :  { %v1248_v60 = vpop.f32.mrb[15].mxu0 }
 0x4b3   :  { %v582_v61 = vpop.f32.mrb[16].mxu0 }
 0x4b4   :  { %589 = vrot.lane.b32.xlu0 %v582_v61, %s1489_s11  ;;  %v1259_v62 = vpop.f32.mrb[17].mxu0 }
 0x4b5   :  { %v585_v63 = vpop.f32.mrb[18].mxu0 }
 0x4b6   :  { %v1260_v1 = vpop.f32.mrb[19].mxu0 }
 0x4cc   :  { %v699_v2 = vpop.f32.mrb[20].mxu0 }
 0x4cd   :  { %705 = vst.msk [vmem:[#allocation2 + $0x8] sm:$0xff] %vm133_vm2, %v699_v2  ;;  %v1271_v3 = vpop.f32.mrb[21].mxu0 }
 0x4ce   :  { %v702_v4 = vpop.f32.mrb[22].mxu0 }
 0x4cf   :  { %v1272_v5 = vpop.f32.mrb[23].mxu0 }
 0x4d4   :  { %v811_v6 = vpop.f32.mrb[24].mxu0 }
 0x4d5   :  { %818 = vrot.lane.b32.xlu1 %v811_v6, %s1474_s13  ;;  %v1283_v8 = vpop.f32.mrb[25].mxu0 }
 0x4d6   :  { %v814_v9 = vpop.f32.mrb[26].mxu0 }
 0x4d7   :  { %v1284_v10 = vpop.f32.mrb[27].mxu0 }
 0x4dc   :  { %v927_v13 = vpop.f32.mrb[28].mxu0 }
 0x4dd   :  { %934 = vrot.lane.b32.xlu1 %v927_v13, %s1488_s25  ;;  %v1295_v14 = vpop.f32.mrb[29].mxu0 }
 0x4de   :  { %v930_v15 = vpop.f32.mrb[30].mxu0 }
 0x4df   :  { %v1296_v16 = vpop.f32.mrb[31].mxu0 }
 0x4e4   :  { %v1043_v17 = vpop.f32.mrb[32].mxu0 }
 0x4e5   :  { %1050 = vrot.lane.b32.xlu1 %v1043_v17, %s1489_s11  ;;  %v1307_v18 = vpop.f32.mrb[33].mxu0 }
 0x4e6   :  { %v1046_v19 = vpop.f32.mrb[34].mxu0 }
 0x4e7   :  { %v1308_v20 = vpop.f32.mrb[35].mxu0 }
 0x4f1   :  { %v356_v21 = vpop.permute.xlu1 %355 }
 0x4f2   :  { %359 = vst.msk [vmem:[#allocation2] sm:$0xff] %vm358_vm5, %v356_v21 }
 0x4f9   :  { %v473_v22 = vpop.permute.xlu0 %472 }
 0x4fa   :  { %476 = vst.msk [vmem:[#allocation2] sm:$0xff] %vm475_vm6, %v473_v22 }
 0x526   :  { %v590_v23 = vpop.permute.xlu0 %589 }
 0x527   :  { %593 = vst.msk [vmem:[#allocation2] sm:$0xff] %vm592_vm7, %v590_v23 }
 0x52e   :  { %v1054_v26 = vld [vmem:[#allocation2] sm:$0xff] }
 0x547   :  { %v819_v0 = vpop.permute.xlu1 %818 }
 0x548   :  { %821 = vst.msk [vmem:[#allocation2 + $0x8] sm:$0xff] %vm358_vm5, %v819_v0 }
 0x54f   :  { %v935_v24 = vpop.permute.xlu1 %934 }
 0x550   :  { %937 = vst.msk [vmem:[#allocation2 + $0x8] sm:$0xff] %vm475_vm6, %v935_v24 }
 0x557   :  { %v1051_v25 = vpop.permute.xlu1 %1050 }
 0x558   :  { %1053 = vst.msk [vmem:[#allocation2 + $0x8] sm:$0xff] %vm592_vm7, %v1051_v25 }
 0x55f   :  { %v1055_v27 = vld [vmem:[#allocation2 + $0x8] sm:$0xff] }
 0x560   :  { %v1056_v28 = vpack.c.bf16 %v1055_v27, %v1054_v26 }
 0x562   :  { %1314 = vmatmul.mubr.msk.bf16.vlgmr.msra.gmra.mrb[32].mxu1 %vm79_vm1, %v1056_v28 }
 0x635   :  { %v1117_v30 = vpop.f32.mrb[32].mxu1 }
 0x636   :  { %v1118_v31 = vadd.f32 %v1163_v29, %v1117_v30  ;;  %v1315_v32 = vpop.f32.mrb[33].mxu1 }
 0x637   :  { %v1120_v33 = vpop.f32.mrb[34].mxu1 }
 0x638   :  { %1124 = vst.msk [vmem:[#allocation9] sm:$0xff] %vm79_vm1, %v1118_v31  ;;  %v1121_v34 = vadd.f32 %v1163_v29, %v1120_v33  ;;  %v1316_v35 = vpop.f32.mrb[35].mxu1 }
 0x63a   :  { %1125 = vst.msk [vmem:[#allocation9 + $0x8] sm:$0xff] %vm79_vm1, %v1121_v34 }
 0x63b   :  { %1452 = shalt.err (!%p1449_p0)
}
 0x63c   :  { %s1453_s19 = scalar_lea.hbm %s1795_s4, 256 }
 0x63d   :  { %p1454_p1 = scmp.ne.s32.totalorder %s1795_s4, %s1453_s19  ;;  %p1457_p2 = scmp.lt.u32.totalorder %s1453_s19, %s1795_s4 }
 0x63f   :  { %p1459_p3 = pnand %p1457_p2, %p1454_p1 }
 0x641   :  { %1462 = shalt.err (!%p1459_p3)
}
 0x642   :  { %1137 = dma.vmem_to_hbm [thread:$0]  %s1132_s16, 256, %s1795_s4, [#allocation5], %s1473_s1, %s1473_s1, %s1474_s13  }
 0x643   :  { %1467 = dma.done.wait [#allocation5], 256  }
 0x644   :  { %1468 = vsyncadd [#allocation5], 4294967040 }
 0x645   :  { %1141 = vsyncpa [#allocation4], 1 }
 0x646   :  { %1142 = vsyncpa [#allocation7], 1 }
 0x647   :  { %1143 = vsyncpa [#allocation5], 1 }

</bundles_post_ra>
